<compile_context>
chip_gen: v7x
topology: tpu7x:2x2x1
jax: 0.10.0
libtpu: 0.0.40
codegen_flags: <defaults>
</compile_context>

<pallas_src>
import math

import jax
import jax.numpy as jnp
from jax.experimental import pallas as pl
from jax.experimental.pallas import tpu as pltpu


def _make_fused_kernel(heads, head_dim, seq_len, matmul_dtype):
    scale = 1.0 / math.sqrt(head_dim)
    rows_per_head = seq_len // heads

    def mm_t(a, b):  # a @ b.T with f32 accumulation
        return jax.lax.dot_general(
            a.astype(matmul_dtype), b.astype(matmul_dtype),
            (((1,), (1,)), ((), ())), preferred_element_type=jnp.float32)

    def mm(a, b):    # a @ b with f32 accumulation
        return jax.lax.dot_general(
            a.astype(matmul_dtype), b.astype(matmul_dtype),
            (((1,), (0,)), ((), ())), preferred_element_type=jnp.float32)

    def kernel(x_ref, wq_ref, wk_ref, wv_ref, wd_ref, o_ref, r_scr):
        x = x_ref[...]                      # (S, D)

        # Per-head projections: wq/wk/wv arrive pre-sliced to this head's rows.
        q = mm_t(x, wq_ref[...]) * scale    # (S, dh); 1/sqrt(dh) folded into q
        k = mm_t(x, wk_ref[...])            # (S, dh)
        v = mm_t(x, wv_ref[...])            # (S, dh)

        # Scaled dot-product attention for this head; softmax math in f32.
        logits = mm_t(q, k)                 # (S, S)
        m = jnp.max(logits, axis=-1, keepdims=True)
        e = jnp.exp(logits - m)
        denom = jnp.sum(e, axis=-1, keepdims=True)
        p = e * pl.reciprocal(denom, approx=True)
        o = mm(p, v)                        # (S, dh), f32

        # Torch does output.reshape(seq, d_model) on the (H, S, dh) tensor
        # (row-major flatten, NOT the usual per-token head concat).  Since
        # S % H == 0, head h's S*dh values land in output rows
        # [h*S/H, (h+1)*S/H) as a row-major block with
        #   band[i, j*dh + d] = o[i*H + j, d].
        for i in range(rows_per_head):
            for j in range(heads):
                r_scr[i:i + 1, j * head_dim:(j + 1) * head_dim] = (
                    o[i * heads + j:i * heads + j + 1, :])

        # Fused dense projection; one lane-dense (S/H, D) block store per head.
        o_ref[0, :, :] = mm_t(r_scr[...], wd_ref[...])

    return kernel


def attention_forward(x, wq, wk, wv, wd, heads, matmul_dtype=jnp.float32):
    seq_len, d_model = x.shape
    assert d_model % heads == 0
    head_dim = d_model // heads
    # The per-head fusion of the dense projection relies on seq_len % heads == 0
    # so that each head's chunk of the torch row-major flatten is a contiguous
    # row band of the (seq, d_model) output.
    assert seq_len % heads == 0
    rows_per_head = seq_len // heads

    # TODO(synk): for production BERT sizes (S >= 512), tile the seq axis
    # flash-style with an online-softmax accumulator instead of materializing
    # the full (S, S) logits per head, and re-derive tiles for v7x's 64 MiB VMEM.

    flops = 8 * seq_len * d_model * d_model + 4 * seq_len * seq_len * d_model
    transcendentals = heads * seq_len * seq_len + heads * seq_len
    bytes_accessed = 4 * (2 * seq_len * d_model + 4 * d_model * d_model)

    out3 = pl.pallas_call(
        _make_fused_kernel(heads, head_dim, seq_len, matmul_dtype),
        out_shape=jax.ShapeDtypeStruct((heads, rows_per_head, d_model),
                                       jnp.float32),
        grid=(heads,),
        in_specs=[
            pl.BlockSpec((seq_len, d_model), lambda h: (0, 0)),    # x (resident)
            pl.BlockSpec((head_dim, d_model), lambda h: (h, 0)),   # wq rows, head h
            pl.BlockSpec((head_dim, d_model), lambda h: (h, 0)),   # wk rows, head h
            pl.BlockSpec((head_dim, d_model), lambda h: (h, 0)),   # wv rows, head h
            pl.BlockSpec((d_model, d_model), lambda h: (0, 0)),    # wd (resident)
        ],
        out_specs=pl.BlockSpec((1, rows_per_head, d_model), lambda h: (h, 0, 0)),
        scratch_shapes=[pltpu.VMEM((rows_per_head, d_model), jnp.float32)],
        compiler_params=pltpu.CompilerParams(
            dimension_semantics=("parallel",)),
        cost_estimate=pl.CostEstimate(
            flops=flops, transcendentals=transcendentals,
            bytes_accessed=bytes_accessed),
    )(x, wq, wk, wv, wd)

    # Free row-major view: (H, S/H, D) -> (S, D); leading dims merge, no copy,
    # no extra kernel.
    return out3.reshape(seq_len, d_model)


def attention_reference(x, wq, wk, wv, wd, heads):
    """Pure-JAX mirror of the PyTorch forward, for verification."""
    seq_len, d_model = x.shape
    head_dim = d_model // heads
    q = (x @ wq.T).reshape(seq_len, heads, head_dim).transpose(1, 0, 2)
    k = (x @ wk.T).reshape(seq_len, heads, head_dim).transpose(1, 0, 2)
    v = (x @ wv.T).reshape(seq_len, heads, head_dim).transpose(1, 0, 2)
    logits = jnp.einsum("hqd,hkd->hqk", q, k) / math.sqrt(head_dim)
    p = jax.nn.softmax(logits, axis=-1)
    output = jnp.einsum("hqk,hkd->hqd", p, v)        # (H, S, dh)
    output = output.reshape(seq_len, d_model)        # torch-exact flatten
    return output @ wd.T


if __name__ == "__main__":
    seq_len = 8
    d_model = 32
    heads = 4

    key = jax.random.PRNGKey(0)
    kx, kq, kk, kv, kd = jax.random.split(key, 5)

    # torch.nn.Linear-style weights: (out_features, in_features), uniform init.
    bound = 1.0 / math.sqrt(d_model)
    x = jax.random.normal(kx, (seq_len, d_model), dtype=jnp.float32)
    wq = jax.random.uniform(kq, (d_model, d_model), jnp.float32, -bound, bound)
    wk = jax.random.uniform(kk, (d_model, d_model), jnp.float32, -bound, bound)
    wv = jax.random.uniform(kv, (d_model, d_model), jnp.float32, -bound, bound)
    wd = jax.random.uniform(kd, (d_model, d_model), jnp.float32, -bound, bound)

    ref = attention_reference(x, wq, wk, wv, wd, heads)

    # Default f32 path (exact module semantics; slack covers approx reciprocal).
    out = attention_forward(x, wq, wk, wv, wd, heads)
    out = jax.block_until_ready(out)
    assert out.shape == (seq_len, d_model)
    assert jnp.allclose(out, ref, atol=5e-3, rtol=5e-3), "f32 kernel mismatch"

    # bf16 matmul operands (v6e/v7x MXU path); softmax + accumulation stay f32.
    out_bf16 = attention_forward(x, wq, wk, wv, wd, heads,
                                 matmul_dtype=jnp.bfloat16)
    out_bf16 = jax.block_until_ready(out_bf16)
    assert jnp.allclose(out_bf16, ref, atol=5e-2, rtol=5e-2), "bf16 mismatch"

    print("KERNEL_OK")
</pallas_src>

<mosaic_0001>
module attributes {stable_mosaic.version = 11 : i64} {
  func.func @kernel(%arg0: i32, %arg1: memref<8x32xf32, #tpu.memory_space<vmem>>, %arg2: memref<8x32xf32, #tpu.memory_space<vmem>>, %arg3: memref<8x32xf32, #tpu.memory_space<vmem>>, %arg4: memref<8x32xf32, #tpu.memory_space<vmem>>, %arg5: memref<32x32xf32, #tpu.memory_space<vmem>>, %arg6: memref<1x2x32xf32, #tpu.memory_space<vmem>>, %arg7: memref<2x32xf32, #tpu.memory_space<vmem>>) attributes {dimension_semantics = [#tpu.dimension_semantics<parallel>], iteration_bounds = array<i64: 4>, scalar_prefetch = 0 : i64, scratch_operands = 1 : i64, tpu.core_type = #tpu.core_type<tc>, window_params = [{pipeline_mode = #tpu.pipeline_mode<synchronous>, transform_indices = @transform_0, window_bounds = array<i64: 8, 32>}, {transform_indices = @transform_1, window_bounds = array<i64: 8, 32>}, {transform_indices = @transform_2, window_bounds = array<i64: 8, 32>}, {transform_indices = @transform_3, window_bounds = array<i64: 8, 32>}, {pipeline_mode = #tpu.pipeline_mode<synchronous>, transform_indices = @transform_4, window_bounds = array<i64: 32, 32>}, {transform_indices = @transform_5, window_bounds = array<i64: 1, 2, 32>}]} {
    %c0 = arith.constant 0 : index
    %c0_0 = arith.constant 0 : index
    %0 = vector.load %arg1[%c0, %c0_0] : memref<8x32xf32, #tpu.memory_space<vmem>>, vector<8x32xf32>
    %c0_1 = arith.constant 0 : index
    %c0_2 = arith.constant 0 : index
    %1 = vector.load %arg2[%c0_1, %c0_2] : memref<8x32xf32, #tpu.memory_space<vmem>>, vector<8x32xf32>
    %cst = arith.constant dense<0.000000e+00> : vector<8x8xf32>
    %2 = tpu.matmul %0, %1, %cst {dimension_numbers = #tpu.dot_dimension_numbers<[1], [1], [0], [0], [0, 0, 1, 0], [], []>} : vector<8x32xf32>, vector<8x32xf32>, vector<8x8xf32> -> vector<8x8xf32>
    %cst_3 = arith.constant 0.353553385 : f32
    %3 = vector.broadcast %cst_3 : f32 to vector<8x8xf32>
    %4 = arith.mulf %2, %3 : vector<8x8xf32>
    %c0_4 = arith.constant 0 : index
    %c0_5 = arith.constant 0 : index
    %5 = vector.load %arg3[%c0_4, %c0_5] : memref<8x32xf32, #tpu.memory_space<vmem>>, vector<8x32xf32>
    %cst_6 = arith.constant dense<0.000000e+00> : vector<8x8xf32>
    %6 = tpu.matmul %0, %5, %cst_6 {dimension_numbers = #tpu.dot_dimension_numbers<[1], [1], [0], [0], [0, 0, 1, 0], [], []>} : vector<8x32xf32>, vector<8x32xf32>, vector<8x8xf32> -> vector<8x8xf32>
    %c0_7 = arith.constant 0 : index
    %c0_8 = arith.constant 0 : index
    %7 = vector.load %arg4[%c0_7, %c0_8] : memref<8x32xf32, #tpu.memory_space<vmem>>, vector<8x32xf32>
    %cst_9 = arith.constant dense<0.000000e+00> : vector<8x8xf32>
    %8 = tpu.matmul %0, %7, %cst_9 {dimension_numbers = #tpu.dot_dimension_numbers<[1], [1], [0], [0], [0, 0, 1, 0], [], []>} : vector<8x32xf32>, vector<8x32xf32>, vector<8x8xf32> -> vector<8x8xf32>
    %cst_10 = arith.constant dense<0.000000e+00> : vector<8x8xf32>
    %9 = tpu.matmul %4, %6, %cst_10 {dimension_numbers = #tpu.dot_dimension_numbers<[1], [1], [0], [0], [0, 0, 1, 0], [], []>} : vector<8x8xf32>, vector<8x8xf32>, vector<8x8xf32> -> vector<8x8xf32>
    %cst_11 = arith.constant dense<0xFF800000> : vector<8xf32>
    %10 = vector.multi_reduction <maximumf>, %9, %cst_11 [1] : vector<8x8xf32> to vector<8xf32>
    %11 = vector.shape_cast %10 : vector<8xf32> to vector<8x1xf32>
    %12 = vector.broadcast %11 : vector<8x1xf32> to vector<8x8xf32>
    %13 = arith.subf %9, %12 : vector<8x8xf32>
    %14 = math.exp %13 : vector<8x8xf32>
    %cst_12 = arith.constant dense<0.000000e+00> : vector<8xf32>
    %15 = vector.multi_reduction <add>, %14, %cst_12 [1] : vector<8x8xf32> to vector<8xf32>
    %16 = vector.shape_cast %15 : vector<8xf32> to vector<8x1xf32>
    %17 = tpu.reciprocal %16 {approx = true} : vector<8x1xf32> -> vector<8x1xf32>
    %18 = vector.broadcast %17 : vector<8x1xf32> to vector<8x8xf32>
    %19 = arith.mulf %14, %18 : vector<8x8xf32>
    %cst_13 = arith.constant dense<0.000000e+00> : vector<8x8xf32>
    %20 = tpu.matmul %19, %8, %cst_13 {dimension_numbers = #tpu.dot_dimension_numbers<[1], [0], [0], [1], [0, 0, 1, 1], [], []>} : vector<8x8xf32>, vector<8x8xf32>, vector<8x8xf32> -> vector<8x8xf32>
    %21 = vector.extract_strided_slice %20 {offsets = [0, 0], sizes = [1, 8], strides = [1, 1]} : vector<8x8xf32> to vector<1x8xf32>
    %c0_14 = arith.constant 0 : index
    %c0_15 = arith.constant 0 : index
    %22 = vector.load %arg7[%c0_14, %c0_15] : memref<2x32xf32, #tpu.memory_space<vmem>>, vector<1x8xf32>
    tpu.vector_store %arg7[%c0_14, %c0_15], %21 {strides = array<i32>} : memref<2x32xf32, #tpu.memory_space<vmem>>, vector<1x8xf32>,
    %23 = vector.extract_strided_slice %20 {offsets = [1, 0], sizes = [1, 8], strides = [1, 1]} : vector<8x8xf32> to vector<1x8xf32>
    %c0_16 = arith.constant 0 : index
    %c8 = arith.constant 8 : index
    %24 = vector.load %arg7[%c0_16, %c8] : memref<2x32xf32, #tpu.memory_space<vmem>>, vector<1x8xf32>
    tpu.vector_store %arg7[%c0_16, %c8], %23 {strides = array<i32>} : memref<2x32xf32, #tpu.memory_space<vmem>>, vector<1x8xf32>,
    %25 = vector.extract_strided_slice %20 {offsets = [2, 0], sizes = [1, 8], strides = [1, 1]} : vector<8x8xf32> to vector<1x8xf32>
    %c0_17 = arith.constant 0 : index
    %c16 = arith.constant 16 : index
    %26 = vector.load %arg7[%c0_17, %c16] : memref<2x32xf32, #tpu.memory_space<vmem>>, vector<1x8xf32>
    tpu.vector_store %arg7[%c0_17, %c16], %25 {strides = array<i32>} : memref<2x32xf32, #tpu.memory_space<vmem>>, vector<1x8xf32>,
    %27 = vector.extract_strided_slice %20 {offsets = [3, 0], sizes = [1, 8], strides = [1, 1]} : vector<8x8xf32> to vector<1x8xf32>
    %c0_18 = arith.constant 0 : index
    %c24 = arith.constant 24 : index
    %28 = vector.load %arg7[%c0_18, %c24] : memref<2x32xf32, #tpu.memory_space<vmem>>, vector<1x8xf32>
    tpu.vector_store %arg7[%c0_18, %c24], %27 {strides = array<i32>} : memref<2x32xf32, #tpu.memory_space<vmem>>, vector<1x8xf32>,
    %29 = vector.extract_strided_slice %20 {offsets = [4, 0], sizes = [1, 8], strides = [1, 1]} : vector<8x8xf32> to vector<1x8xf32>
    %c1 = arith.constant 1 : index
    %c0_19 = arith.constant 0 : index
    %30 = vector.load %arg7[%c1, %c0_19] : memref<2x32xf32, #tpu.memory_space<vmem>>, vector<1x8xf32>
    tpu.vector_store %arg7[%c1, %c0_19], %29 {strides = array<i32>} : memref<2x32xf32, #tpu.memory_space<vmem>>, vector<1x8xf32>,
    %31 = vector.extract_strided_slice %20 {offsets = [5, 0], sizes = [1, 8], strides = [1, 1]} : vector<8x8xf32> to vector<1x8xf32>
    %c1_20 = arith.constant 1 : index
    %c8_21 = arith.constant 8 : index
    %32 = vector.load %arg7[%c1_20, %c8_21] : memref<2x32xf32, #tpu.memory_space<vmem>>, vector<1x8xf32>
    tpu.vector_store %arg7[%c1_20, %c8_21], %31 {strides = array<i32>} : memref<2x32xf32, #tpu.memory_space<vmem>>, vector<1x8xf32>,
    %33 = vector.extract_strided_slice %20 {offsets = [6, 0], sizes = [1, 8], strides = [1, 1]} : vector<8x8xf32> to vector<1x8xf32>
    %c1_22 = arith.constant 1 : index
    %c16_23 = arith.constant 16 : index
    %34 = vector.load %arg7[%c1_22, %c16_23] : memref<2x32xf32, #tpu.memory_space<vmem>>, vector<1x8xf32>
    tpu.vector_store %arg7[%c1_22, %c16_23], %33 {strides = array<i32>} : memref<2x32xf32, #tpu.memory_space<vmem>>, vector<1x8xf32>,
    %35 = vector.extract_strided_slice %20 {offsets = [7, 0], sizes = [1, 8], strides = [1, 1]} : vector<8x8xf32> to vector<1x8xf32>
    %c1_24 = arith.constant 1 : index
    %c24_25 = arith.constant 24 : index
    %36 = vector.load %arg7[%c1_24, %c24_25] : memref<2x32xf32, #tpu.memory_space<vmem>>, vector<1x8xf32>
    tpu.vector_store %arg7[%c1_24, %c24_25], %35 {strides = array<i32>} : memref<2x32xf32, #tpu.memory_space<vmem>>, vector<1x8xf32>,
    %c0_26 = arith.constant 0 : index
    %c0_27 = arith.constant 0 : index
    %37 = vector.load %arg7[%c0_26, %c0_27] : memref<2x32xf32, #tpu.memory_space<vmem>>, vector<2x32xf32>
    %c0_28 = arith.constant 0 : index
    %c0_29 = arith.constant 0 : index
    %38 = vector.load %arg5[%c0_28, %c0_29] : memref<32x32xf32, #tpu.memory_space<vmem>>, vector<32x32xf32>
    %cst_30 = arith.constant dense<0.000000e+00> : vector<2x32xf32>
    %39 = tpu.matmul %37, %38, %cst_30 {dimension_numbers = #tpu.dot_dimension_numbers<[1], [1], [0], [0], [0, 0, 1, 0], [], []>} : vector<2x32xf32>, vector<32x32xf32>, vector<2x32xf32> -> vector<2x32xf32>
    %c0_31 = arith.constant 0 : index
    %c0_32 = arith.constant 0 : index
    %c0_33 = arith.constant 0 : index
    %40 = vector.load %arg6[%c0_31, %c0_32, %c0_33] : memref<1x2x32xf32, #tpu.memory_space<vmem>>, vector<1x2x32xf32>
    %41 = vector.shape_cast %40 : vector<1x2x32xf32> to vector<2x32xf32>
    %42 = vector.shape_cast %39 : vector<2x32xf32> to vector<1x2x32xf32>
    tpu.vector_store %arg6[%c0_31, %c0_32, %c0_33], %42 {strides = array<i32>} : memref<1x2x32xf32, #tpu.memory_space<vmem>>, vector<1x2x32xf32>,
    return
  }
  func.func @transform_0(%arg0: i32) -> (i32, i32) {
    %c0_i32 = arith.constant 0 : i32
    %c0_i32_0 = arith.constant 0 : i32
    %c0_i32_1 = arith.constant 0 : i32
    return %c0_i32, %c0_i32_0 : i32, i32
  }
  func.func @transform_1(%arg0: i32) -> (i32, i32) {
    %c0_i32 = arith.constant 0 : i32
    %c0_i32_0 = arith.constant 0 : i32
    return %arg0, %c0_i32 : i32, i32
  }
  func.func @transform_2(%arg0: i32) -> (i32, i32) {
    %c0_i32 = arith.constant 0 : i32
    %c0_i32_0 = arith.constant 0 : i32
    return %arg0, %c0_i32 : i32, i32
  }
  func.func @transform_3(%arg0: i32) -> (i32, i32) {
    %c0_i32 = arith.constant 0 : i32
    %c0_i32_0 = arith.constant 0 : i32
    return %arg0, %c0_i32 : i32, i32
  }
  func.func @transform_4(%arg0: i32) -> (i32, i32) {
    %c0_i32 = arith.constant 0 : i32
    %c0_i32_0 = arith.constant 0 : i32
    %c0_i32_1 = arith.constant 0 : i32
    return %c0_i32, %c0_i32_0 : i32, i32
  }
  func.func @transform_5(%arg0: i32) -> (i32, i32, i32) {
    %c0_i32 = arith.constant 0 : i32
    %c0_i32_0 = arith.constant 0 : i32
    %c0_i32_1 = arith.constant 0 : i32
    return %arg0, %c0_i32, %c0_i32_0 : i32, i32, i32
  }
}

</mosaic_0001>

<bundles_post_ra>
// kernel: tpu_custom_call.1
= control target key start
LH: loop header
LB: loop body
LE: loop exit
PB: predicated region body
PF: predicated region fallthrough
CT: control target
= control target key end

     0   :  { %s1764_s0 = inlined_call_operand.hbm [shape: f32[8,32], index: 0, kind: input, shape index: {}]   ;;  %s1765_s1 = inlined_call_operand.hbm [shape: f32[32,32], index: 1, kind: input, shape index: {}]   ;;  %s1766_s2 = inlined_call_operand.hbm [shape: f32[32,32], index: 2, kind: input, shape index: {}]   ;;  %s1767_s3 = inlined_call_operand.hbm [shape: f32[32,32], index: 3, kind: input, shape index: {}]   ;;  %s1768_s4 = inlined_call_operand.hbm [shape: f32[32,32], index: 4, kind: input, shape index: {}]   ;;  %s1769_s5 = inlined_call_operand.hbm [shape: f32[4,2,32], index: 5, kind: output, shape index: {}]  }
   0x1   :  { %1782 = sst [smem:[#allocation19_spill]] %s1765_s1 }
   0x2   :  { %1783 = sst [smem:[#allocation20_spill]] %s1768_s4 }
   0x3   :  { %10 = vsyncpa [#allocation4], 0 }
   0x4   :  { %11 = vsyncpa [#allocation7], 0 }
   0x5   :  { %13 = vsyncpa [#allocation7 + $0x1], 0 }
   0x6   :  { %14 = vsyncpa [#allocation10], 0 }
   0x7   :  { %16 = vsyncpa [#allocation10 + $0x1], 0 }
   0x8   :  { %17 = vsyncpa [#allocation5], 0 }
   0x9   :  { %19 = vsyncpa [#allocation5 + $0x1], 0  ;;  %s1447_s18 = smov 0   ;;  %s1449_s19 = smov 0  }
   0xa   :  { %s1451_s20 = smov 0   ;;  %s1453_s21 = smov 0  }
   0xb LB: > { %s1468_s22 = sadd.s32 4294967295, %s1401_s21   ;;  %s993_s23 = sadd.s32 4294967294, %s1401_s21   ;;  %s1401_s21 = sphi %s1453_s21, %s1814_s21   ;;  %s1397_s20 = sphi %s1451_s20, %s1813_s20   ;;  %s1393_s19 = sphi %s1449_s19, %s1812_s19   ;;  %s1389_s18 = sphi %s1447_s18, %s1811_s18  }
   0xc   : > { %p66_p0 = scmp.ne.s32.totalorder %s1393_s19, %s1389_s18  ;;  %p1770_p1 = scmp.eq.s32.totalorder %s1468_s22, 0 }
   0xd   : > { %p169_p3 = scmp.eq.s32.totalorder %s993_s23, 3  ;;  %p994_p5 = scmp.ge.s32.totalorder %s1401_s21, 1 }
   0xe   : > { %p1477_p4 = por %p1770_p1, %p66_p0  ;;  %p176_p7 = scmp.lt.s32.totalorder %s1401_s21, 5 }
   0xf   : > { %p1482_p6 = por %p169_p3, %p66_p0  ;;  %s1403_s27 = smov [#allocation11]  }
  0x10   : > { %s1784_s24 = scalar_select %p1477_p4, 1, 0 }
  0x11   : > { %s1785_s25 = scalar_select %p1482_p6, 1, 0 }
  0x12   : > { %p1487_p8 = pnand %p994_p5, %p176_p7  ;;  %s199_s28 = sshll.u32 %s1403_s27, 4  ;;  %s200_s28 = int_to_ptr.vmem [resolvable:$true] %s199_s28 }
  0x13   : > { %s1500_s30 = sadd.s32 1, %s1401_s21   ;;  %s53_s6 = sadd.s32 1, %s1397_s20 }
  0x14   : > { %s1786_s26 = scalar_select %p1487_p8, 1, 0 }
  0x15   : > { %p1104_p9 = pneg %p1487_p8  ;;  %s50_s7 = ssub.s32 %s1401_s21, %s1500_s30 }
  0x16   : > { %s1788_s4 = sld [smem:[#allocation20_spill]] }
  0x17   : > { %p1495_p10 = pnand %p1104_p9, %p1770_p1 }
  0x19   : > { %s1787_s29 = scalar_select %p1495_p10, 1, 0 }
  0x1a   : > { %p1774_p12 = pneg %p1495_p10 }
  0x1c   : > { %s1177_s10 = scalar_lea.hbm %s1788_s4, 512 }
  0x1d   : > { %p1178_p11 = scmp.ne.s32.totalorder %s1788_s4, %s1177_s10  ;;  %p1184_p3 = scmp.lt.u32.totalorder %s1177_s10, %s1788_s4 }
  0x1f   : > { %p1180_p13 = pnand %p1774_p12, %p1178_p11 }
  0x21   : > { %p1181_p0 = pneg %p1180_p13 }
  0x23   : > { %p1186_p5 = pnand %p1184_p3, %p1181_p0 }
  0x25   : > { %1189 = shalt.err (!%p1186_p5)
}
  0x26   : > { %s1190_s15 = scalar_lea.vmem %s200_s28, 512  ;;  %p1198_p2 = scmp.lt.s32.totalorder %s200_s28, %s200_s28 }
  0x27   : > { %p1191_p7 = scmp.ne.s32.totalorder %s200_s28, %s1190_s15  ;;  %p1199_p6 = scmp.lt.s32.totalorder %s1190_s15, %s1190_s15 }
  0x29   : > { %p1193_p9 = pnand %p1191_p7, %p1774_p12  ;;  %p1200_p4 = por %p1199_p6, %p1198_p2 }
  0x2b   : > { %p1194_p1 = pneg %p1193_p9 }
  0x2d   : > { %p1201_p8 = pnand %p1200_p4, %p1194_p1 }
  0x2f   : > { %1204 = shalt.err (!%p1201_p8)
}
  0x30   : > { %s1404_s16 = smov 128   ;;  %s1405_s17 = smov 8  }
  0x31   : > { %1110 = dma.hbm_to_vmem [thread:$0]  (!%p1495_p10), %s1788_s4, 512, %s200_s28, [#allocation10], %s1404_s16, %s1404_s16, %s1405_s17  }
  0x32   : > { %p51_p2 = scmp.eq.s32.totalorder %s50_s7, 0  ;;  %p60_p1 = scmp.ne.s32.totalorder %s1397_s20, %s1393_s19 }
  0x33   : > { %p61_p4 = scmp.eq.s32.totalorder %s1401_s21, 0  ;;  %p1127_p6 = scmp.lt.s32.totalorder %s1401_s21, 4 }
  0x34   : > { %s1532_s8 = scalar_select %p51_p2, %s1397_s20, %s53_s6  }
  0x35   : > { %p62_p8 = por %p61_p4, %p60_p1  ;;  %p1790_p11 = scmp.eq.s32.totalorder %s1468_s22, 3 }
  0x36   : > { %1789 = sst [smem:[#allocation18_spill]] %s1532_s8  ;;  %s1773_s10 = sand.u32 1, %s1401_s21  }
  0x37   : > { %p1536_p13 = por %p1790_p11, %p60_p1  ;;  %s215_s11 = sand.u32 1, %s1397_s20  }
  0x38   : > { %s1542_s12 = sshll.u32 %s215_s11, 3  ;;  %s1545_s13 = sshll.u32 %s1401_s21, 7 }
  0x39   : > { %s1791_s9 = scalar_select %p1536_p13, 1, 0 }
  0x3a   : > { %s1792_s1 = sld [smem:[#allocation19_spill]]  ;;  %s217_s6 = scalar_lea.vmem [#allocation6], %s1542_s12 }
  0x3b   : > { %s224_s15 = sshll.u32 %s217_s6, 4  ;;  %p1556_p0 = pnand %p1127_p6, %p62_p8  ;;  %s1554_s15 = int_to_ptr.vmem [resolvable:$true] %s224_s15 }
  0x3c   : > { %s1406_s17 = smov [#allocation3]   ;;  %s1564_s27 = scalar_lea.sflag [#allocation7], %s1773_s10 }
  0x3d   : > { %s1793_s16 = scalar_select %p1556_p0, 1, 0 }
  0x3e   : > { %s1560_s23 = sshll.u32 %s1406_s17, 4  ;;  %p1570_p5 = pneg %p1556_p0  ;;  %s190_s23 = int_to_ptr.vmem [resolvable:$true] %s1560_s23 }
  0x40   : > { %s1551_s14 = scalar_lea.hbm %s1792_s1, %s1545_s13  ;;  %s1210_s4 = scalar_lea.hbm %s1792_s1, 512 }
  0x41   : > { %s1205_s11 = scalar_lea.hbm %s1551_s14, 128  ;;  %p1211_p2 = scmp.lt.u32.totalorder %s1551_s14, %s1792_s1 }
  0x42   : > { %p1206_p3 = scmp.ne.s32.totalorder %s1551_s14, %s1205_s11  ;;  %p1212_p1 = scmp.lt.u32.totalorder %s1210_s4, %s1205_s11 }
  0x43   : > { %s1794_s28 = scalar_select %p1570_p5, 1, 0 }
  0x44   : > { %p1208_p7 = pnand %p1570_p5, %p1206_p3  ;;  %p1213_p4 = por %p1212_p1, %p1211_p2 }
  0x45   : > { %p1214_p6 = scmp.lt.u32.totalorder %s1205_s11, %s1551_s14 }
  0x46   : > { %p1209_p9 = pneg %p1208_p7 }
  0x47   : > { %p1215_p8 = por %p1214_p6, %p1213_p4 }
  0x49   : > { %p1216_p11 = pnand %p1215_p8, %p1209_p9 }
  0x4b   : > { %1219 = shalt.err (!%p1216_p11)
}
  0x4c   : > { %s1220_s10 = scalar_lea.vmem %s1554_s15, 128  ;;  %s1407_s7 = smov [#allocation6]  }
  0x4d   : > { %p1221_p3 = scmp.ne.s32.totalorder %s1554_s15, %s1220_s10  ;;  %s1225_s6 = sshll.u32 %s1407_s7, 4  ;;  %s1226_s6 = int_to_ptr.vmem [resolvable:$false] %s1225_s6 }
  0x4e   : > { %s1227_s8 = scalar_lea.vmem %s1226_s6, 256  ;;  %p1228_p13 = scmp.lt.s32.totalorder %s1554_s15, %s1226_s6 }
  0x4f   : > { %p1223_p7 = pnand %p1221_p3, %p1570_p5  ;;  %p1229_p10 = scmp.lt.s32.totalorder %s1227_s8, %s1220_s10 }
  0x51   : > { %p1224_p12 = pneg %p1223_p7  ;;  %p1230_p2 = por %p1229_p10, %p1228_p13 }
  0x53   : > { %p1231_p1 = pnand %p1230_p2, %p1224_p12 }
  0x55   : > { %1234 = shalt.err (!%p1231_p1)
}
  0x56   : > { %1114 = dma.hbm_to_vmem [thread:$0]  (!%p1556_p0), %s1551_s14, 128, %s1554_s15, %s1564_s27  }
  0x57   : > { %s1235_s17 = scalar_lea.hbm %s1764_s0, 128  ;;  %p1795_p10 = scmp.ne.s32.totalorder %s1787_s29, 0 }
  0x58   : > { %p1236_p9 = scmp.ne.s32.totalorder %s1764_s0, %s1235_s17  ;;  %p1242_p6 = scmp.lt.u32.totalorder %s1235_s17, %s1764_s0 }
  0x59   : > { %p1796_p12 = pneg %p1795_p10 }
  0x5b   : > { %p1238_p13 = pnand %p1236_p9, %p1796_p12 }
  0x5d   : > { %p1239_p4 = pneg %p1238_p13 }
  0x5f   : > { %p1244_p8 = pnand %p1242_p6, %p1239_p4 }
  0x61   : > { %1247 = shalt.err (!%p1244_p8)
}
  0x62   : > { %s1248_s14 = scalar_lea.vmem %s190_s23, 128  ;;  %p1797_p3 = pmov %p1796_p12 }
  0x63   : > { %p1249_p11 = scmp.ne.s32.totalorder %s190_s23, %s1248_s14  ;;  %p1256_p1 = scmp.lt.s32.totalorder %s190_s23, %s190_s23 }
  0x64   : > { %p1257_p0 = scmp.lt.s32.totalorder %s1248_s14, %s1248_s14 }
  0x65   : > { %p1251_p7 = pnand %p1249_p11, %p1797_p3 }
  0x66   : > { %p1258_p5 = por %p1257_p0, %p1256_p1 }
  0x67   : > { %p1252_p2 = pneg %p1251_p7 }
  0x69   : > { %p1259_p9 = pnand %p1258_p5, %p1252_p2 }
  0x6b   : > { %1262 = shalt.err (!%p1259_p9)
}
  0x6c   : > { %1107 = dma.hbm_to_vmem [thread:$0]  (!%p1795_p10), %s1764_s0, 128, %s190_s23, [#allocation4]  }
  0x6d   : > { %s1619_s11 = scalar_lea.hbm %s1766_s2, %s1545_s13  ;;  %s235_s17 = scalar_lea.vmem [#allocation8], %s1542_s12 }
  0x6e   : > { %s242_s7 = sshll.u32 %s235_s17, 4  ;;  %s1263_s29 = scalar_lea.hbm %s1619_s11, 128  ;;  %s243_s7 = int_to_ptr.vmem [resolvable:$true] %s242_s7 }
  0x6f   : > { %p1264_p0 = scmp.ne.s32.totalorder %s1619_s11, %s1263_s29  ;;  %p1798_p5 = scmp.ne.s32.totalorder %s1794_s28, 0 }
  0x70   : > { %s1268_s23 = scalar_lea.hbm %s1766_s2, 512  ;;  %p1269_p10 = scmp.lt.u32.totalorder %s1619_s11, %s1766_s2 }
  0x71   : > { %p1266_p12 = pnand %p1264_p0, %p1798_p5  ;;  %p1270_p4 = scmp.lt.u32.totalorder %s1268_s23, %s1263_s29 }
  0x72   : > { %p1272_p8 = scmp.lt.u32.totalorder %s1263_s29, %s1619_s11 }
  0x73   : > { %p1267_p13 = pneg %p1266_p12  ;;  %p1271_p6 = por %p1270_p4, %p1269_p10 }
  0x75   : > { %p1273_p11 = por %p1272_p8, %p1271_p6 }
  0x77   : > { %p1274_p3 = pnand %p1273_p11, %p1267_p13 }
  0x79   : > { %1277 = shalt.err (!%p1274_p3)
}
  0x7a   : > { %s1278_s15 = scalar_lea.vmem %s243_s7, 128  ;;  %s1408_s8 = smov [#allocation8]  }
  0x7b   : > { %p1279_p7 = scmp.ne.s32.totalorder %s243_s7, %s1278_s15  ;;  %s1283_s4 = sshll.u32 %s1408_s8, 4  ;;  %s1284_s4 = int_to_ptr.vmem [resolvable:$false] %s1283_s4 }
  0x7c   : > { %s1285_s17 = scalar_lea.vmem %s1284_s4, 256  ;;  %p1286_p9 = scmp.lt.s32.totalorder %s243_s7, %s1284_s4 }
  0x7d   : > { %p1281_p2 = pnand %p1279_p7, %p1798_p5  ;;  %p1287_p0 = scmp.lt.s32.totalorder %s1285_s17, %s1278_s15 }
  0x7f   : > { %p1282_p1 = pneg %p1281_p2  ;;  %p1288_p12 = por %p1287_p0, %p1286_p9 }
  0x81   : > { %p1289_p4 = pnand %p1288_p12, %p1282_p1 }
  0x83   : > { %1292 = shalt.err (!%p1289_p4)
}
  0x84   : > { %p1799_p10 = scmp.ne.s32.totalorder %s1793_s16, 0  ;;  %s1644_s6 = scalar_lea.hbm %s1767_s3, %s1545_s13 }
  0x85   : > { %s253_s23 = scalar_lea.vmem [#allocation9], %s1542_s12  ;;  %s1800_s1 = sand.u32 1, %s1401_s21  }
  0x86   : > { %1117 = dma.hbm_to_vmem [thread:$0]  (!%p1799_p10), %s1619_s11, 128, %s243_s7, %s1564_s27  }
  0x87   : > { %s260_s14 = sshll.u32 %s253_s23, 4  ;;  %s250_s15 = scalar_lea.sflag [#allocation10], %s1800_s1  ;;  %s261_s14 = int_to_ptr.vmem [resolvable:$true] %s260_s14 }
  0x88   : > { %s1293_s8 = scalar_lea.hbm %s1644_s6, 128  ;;  %s1298_s7 = scalar_lea.hbm %s1767_s3, 512 }
  0x89   : > { %p1294_p13 = scmp.ne.s32.totalorder %s1644_s6, %s1293_s8  ;;  %p1299_p11 = scmp.lt.u32.totalorder %s1644_s6, %s1767_s3 }
  0x8a   : > { %p1300_p3 = scmp.lt.u32.totalorder %s1298_s7, %s1293_s8  ;;  %p1302_p2 = scmp.lt.u32.totalorder %s1293_s8, %s1644_s6 }
  0x8b   : > { %p1296_p6 = pnand %p1294_p13, %p1798_p5 }
  0x8c   : > { %p1301_p7 = por %p1300_p3, %p1299_p11 }
  0x8d   : > { %p1297_p8 = pneg %p1296_p6 }
  0x8e   : > { %p1303_p1 = por %p1302_p2, %p1301_p7 }
  0x90   : > { %p1304_p9 = pnand %p1303_p1, %p1297_p8 }
  0x92   : > { %1307 = shalt.err (!%p1304_p9)
}
  0x93   : > { %s1308_s12 = scalar_lea.vmem %s261_s14, 128  ;;  %s1409_s17 = smov [#allocation9]  }
  0x94   : > { %p1309_p0 = scmp.ne.s32.totalorder %s261_s14, %s1308_s12  ;;  %s1313_s29 = sshll.u32 %s1409_s17, 4  ;;  %s1314_s29 = int_to_ptr.vmem [resolvable:$false] %s1313_s29 }
  0x95   : > { %s1315_s10 = scalar_lea.vmem %s1314_s29, 256  ;;  %p1316_p13 = scmp.lt.s32.totalorder %s261_s14, %s1314_s29 }
  0x96   : > { %p1311_p12 = pnand %p1309_p0, %p1798_p5  ;;  %p1317_p6 = scmp.lt.s32.totalorder %s1315_s10, %s1308_s12 }
  0x98   : > { %p1312_p4 = pneg %p1311_p12  ;;  %p1318_p10 = por %p1317_p6, %p1316_p13 }
  0x9a   : > { %p1319_p3 = pnand %p1318_p10, %p1312_p4 }
  0x9c   : > { %1322 = shalt.err (!%p1319_p3)
}
  0x9d   : > { %p1801_p11 = scmp.ne.s32.totalorder %s1793_s16, 0  ;;  %p1802_p8 = scmp.ne.s32.totalorder %s1786_s26, 0 }
  0x9e   : > { %p1803_p7 = scmp.eq.s32.totalorder (!%p1802_p8), %s1468_s22, 0 }
  0x9f   : > { %1120 = dma.hbm_to_vmem [thread:$0]  (!%p1801_p11), %s1644_s6, 128, %s261_s14, %s250_s15  }
  0xa0   : > { %269 = sbr.rel (%p1802_p8) target bundleno = 1498 (0x5da), region = 40 }
  0xa7   : > { %1368 = dma.done.wait (%p1803_p7), [#allocation4], 128   ;;  %p1804_p5 = pmov %p1803_p7 }
  0xa8   : > { %s275_s28 = sand.u32 1, %s1468_s22   ;;  %s1674_s23 = sand.u32 1, %s1393_s19  }
  0xa9   : > { %1370 = vsyncadd (%p1804_p5), [#allocation4], 4294967168  ;;  %s1677_s1 = sshll.u32 %s1674_s23, 3  ;;  %s276_s16 = scalar_lea.sflag [#allocation7], %s275_s28 }
  0xaa   : > { %s279_s6 = scalar_lea.vmem [#allocation6], %s1677_s1  ;;  %p1805_p10 = scmp.ne.s32.totalorder %s1784_s24, 0 }
  0xac   : > { %1372 = dma.done.wait (%p1805_p10), %s276_s16, 256  }
  0xad   : > { %1374 = vsyncadd (%p1805_p10), %s276_s16, 4294967040  ;;  %s288_s26 = scalar_lea.vmem [#allocation8], %s1677_s1  ;;  %s294_s14 = scalar_lea.sflag [#allocation10], %s275_s28 }
  0xae   : > { %s297_s15 = scalar_lea.vmem [#allocation9], %s1677_s1 }
  0xaf   : > { %1376 = dma.done.wait (%p1805_p10), %s294_s14, 128  }
  0xb0   : > { %1378 = vsyncadd (%p1805_p10), %s294_s14, 4294967168  ;;  %p1806_p2 = pmov %p1804_p5 }
  0xb2   : > { %1380 = dma.done.wait (%p1806_p2), [#allocation10], 512   ;;  %p1807_p1 = pmov %p1806_p2 }
  0xb3   : > { %v1410_v0 = vmov 0.0   ;;  %vm1411_vm0 = vmmov 0   ;;  %vm340_vm1 = vcmask 261120   ;;  %v339_v1 = vld [vmem:[%s279_s6] sm:$0xff]  ;;  %v338_v2 = vld [vmem:[#allocation3] sm:$0xff]  ;;  %vm566_vm2 = vcmask 64512  }
  0xb4   : > { %1382 = vsyncadd (%p1807_p1), [#allocation10], 4294966784  ;;  %1044 = vmatprep.subr.mxu0 %v1410_v0  ;;  %1046 = vmatprep.mubr.msk.f32.mxu0 %vm1411_vm0, %v1410_v0  ;;  %v418_v3 = vld [vmem:[%s288_s26] sm:$0xff]  ;;  %v492_v9 = vld [vmem:[%s297_s15] sm:$0xff]  ;;  %v1412_v25 = vmov 0.0|0.0   ;;  %vm727_vm4 = vcmask 57344  }
  0xb5   : > { %1059 = vmatprep.subr.mxu1 %v1410_v0  ;;  %1061 = vmatprep.mubr.msk.f32.mxu1 %vm1411_vm0, %v1410_v0  ;;  %v754_v23 = vld [vmem:[#allocation11] sm:$0xff]  ;;  %v755_v24 = vld [vmem:[#allocation11 + $0x8] sm:$0xff]  ;;  %vm1082_vm3 = vmpackc.low %vm340_vm1, %vm340_vm1  ;;  %vm745_vm5 = vcmask 61444   ;;  %s1413_s24 = smov 24   ;;  %s1414_s8 = smov 8   ;;  %vm733_vm6 = vcmask 123969  }
  0xb6   : > { %1045 = vmatpush3.xpose.msk.msra.mxu0 %vm340_vm1, %v339_v1  ;;  %v1081_v26 = vpack.c.bf16 %v755_v24, %v754_v23  ;;  %v756_v27 = vld [vmem:[#allocation11 + $0x10] sm:$0xff]  ;;  %v757_v28 = vld [vmem:[#allocation11 + $0x18] sm:$0xff]  ;;  %s1415_s27 = smov 16   ;;  %vm747_vm7 = vcmask 128069   ;;  %vm738_vm8 = vcmask 190594   ;;  %vm749_vm9 = vcmask 194694  }
  0xb7   : > { %1049 = vmatprep.subr.mxu0 %v1410_v0  ;;  %v1085_v29 = vpack.c.bf16 %v757_v28, %v756_v27  ;;  %vm743_vm10 = vcmask 257219   ;;  %vm751_vm11 = vcmask 261319   ;;  %s1010_s11 = sshll.u32 %s1674_s23, 1  ;;  %s1026_s7 = sshll.u32 %s1468_s22, 5  ;;  %vm843_vm12 = vcmask 254976  }
  0xb8   : > { %s337_s13 = scalar_lea.vmem [#allocation12], %s1010_s11  ;;  %s1721_s29 = scalar_lea.hbm %s1769_s5, %s1026_s7 }
  0xb9   : > { %1047 = vmatmul.mubr.msk.f32.vlgmr.msra.gmra.mrb[0].mxu0 %vm340_vm1, %v338_v2  ;;  %s859_s4 = sshll.u32 %s337_s13, 4  ;;  %s846_s10 = scalar_lea.sflag [#allocation5], %s1674_s23  ;;  %s1723_s4 = int_to_ptr.vmem [resolvable:$true] %s859_s4 }
  0xba   : > { %1050 = vmatpush3.xpose.msk.msra.mxu0 %vm340_vm1, %v418_v3  ;;  %1051 = vmatprep.mubr.msk.f32.mxu0 %vm1411_vm0, %v1410_v0  ;;  %s1323_s28 = scalar_lea.vmem %s1723_s4, 32  ;;  %p1808_p0 = scmp.ne.s32.totalorder %s1791_s9, 0 }
  0xbb   : > { %1054 = vmatprep.subr.mxu0 %v1410_v0  ;;  %p1324_p9 = scmp.ne.s32.totalorder %s1723_s4, %s1323_s28  ;;  %s1416_s22 = smov [#allocation12]  }
  0xbc   : > { %s1327_s1 = sshll.u32 %s1416_s22, 4  ;;  %s1328_s1 = int_to_ptr.vmem [resolvable:$false] %s1327_s1 }
  0xbd   : > { %1052 = vmatmul.mubr.msk.f32.vlgmr.msra.gmra.mrb[2].mxu0 %vm340_vm1, %v338_v2  ;;  %p1325_p12 = pnand %p1324_p9, %p1808_p0  ;;  %s1329_s16 = scalar_lea.vmem %s1328_s1, 64 }
  0xbe   : > { %1056 = vmatprep.mubr.msk.f32.mxu0 %vm1411_vm0, %v1410_v0  ;;  %1055 = vmatpush3.xpose.msk.msra.mxu0 %vm340_vm1, %v492_v9  ;;  %p1330_p13 = scmp.lt.s32.totalorder %s1723_s4, %s1328_s1  ;;  %p1331_p6 = scmp.lt.s32.totalorder %s1329_s16, %s1323_s28 }
  0xbf   : > { %1064 = vmatprep.subr.mxu0 %v1410_v0  ;;  %p1326_p4 = pneg %p1325_p12 }
  0xc0   : > { %p1332_p3 = por %p1331_p6, %p1330_p13 }
  0xc1   : > { %1057 = vmatmul.mubr.msk.f32.vlgmr.msra.gmra.mrb[4].mxu0 %vm340_vm1, %v338_v2 }
  0xc2   : > { %1066 = vmatprep.mubr.msk.f32.mxu0 %vm1411_vm0, %v1410_v0  ;;  %p1333_p11 = pnand %p1332_p3, %p1326_p4 }
 0x18c   : > { %v413_v4 = vpop.f32.mrb[0].mxu0 }
 0x18d   : > { %v1048_v5 = vpop.f32.mrb[1].mxu0  ;;  %v417_v8 = vmul.f32 0.35355338, %v413_v4 }
 0x190   : > { %v488_v6 = vpop.f32.mrb[2].mxu0 }
 0x191   : > { %v1053_v7 = vpop.f32.mrb[3].mxu0  ;;  %1060 = vmatpush3.xpose.msk.msra.mxu1 %vm566_vm2, %v488_v6 }
 0x192   : > { %1080 = vmatprep.subr.bf16.mxu1 %v1412_v25 }
 0x194   : > { %1062 = vmatmul.mubr.msk.f32.vlgmr.msra.gmra.mrb[0].mxu1 %vm566_vm2, %v417_v8  ;;  %v562_v18 = vpop.f32.mrb[4].mxu0 }
 0x195   : > { %1077 = vmatprep.mubr.msk.f32.mxu1 %vm1411_vm0, %v1410_v0  ;;  %v1058_v19 = vpop.f32.mrb[5].mxu0  ;;  %1065 = vmatpush3.msra.mxu0 %v562_v18 }
 0x196   : > { %1083 = vmatpush3.bf16.xpose.msk.msra.mxu1 %vm1082_vm3, %v1081_v26 }
 0x197   : > { %1084 = vmatprep.subr.bf16.mxu1 %v1412_v25 }
 0x19e   : > { %1087 = vmatpush3.bf16.xpose.msk.msra.mxu1 %vm1082_vm3, %v1085_v29 }
 0x267   : > { %v639_v10 = vpop.f32.mrb[0].mxu1 }
 0x268   : > { %v1063_v11 = vpop.f32.mrb[1].mxu1  ;;  %v643_v12 = vsel %vm566_vm2, %v639_v10, -inf }
 0x269   : > { %644 = vmax.xlane.f32.xlu0 %v643_v12 }
 0x2f6   : > { %v645_v13 = vpop.xlane.xlu0 %644 }
 0x2f7   : > { %v646_v14 = vsub.f32 %v639_v10, %v645_v13 }
 0x2f9   : > { %v647_v15 = vmul.f32 1.442695, %v646_v14 }
 0x2fb   : > { %1173 = vpow2.f32 %v647_v15 }
 0x305   : > { %v1174_v16 = vpop.eup %1173 }
 0x306   : > { %v649_v17 = vsel %vm566_vm2, %v1174_v16, 0.0 }
 0x307   : > { %650 = vadd.xlane.f32.xlu0 %v649_v17 }
 0x394   : > { %v651_v20 = vpop.xlane.xlu0 %650 }
 0x395   : > { %1175 = vrcp.f32 %v651_v20 }
 0x39f   : > { %v1176_v21 = vpop.eup %1175 }
 0x3a0   : > { %v653_v22 = vmul.f32 %v1176_v21, %v1174_v16 }
 0x3a2   : > { %1067 = vmatmul.mubr.msk.f32.vlgmr.msra.gmra.mrb[6].mxu0 %vm566_vm2, %v653_v22 }
 0x475   : > { %v723_v30 = vpop.f32.mrb[6].mxu0 }
 0x476   : > { %740 = vrot.lane.b32.xlu0 %v723_v30, %s1413_s24  ;;  %730 = vrot.lane.b32.xlu1 %v723_v30, %s1414_s8  ;;  %v1068_v31 = vpop.f32.mrb[7].mxu0  ;;  %728 = vst.msk [vmem:[#allocation2] sm:$0x1] %vm727_vm4, %v723_v30 }
 0x477   : > { %746 = vst.msk [vmem:[#allocation2 - $0x3] sm:$0x10] %vm745_vm5, %v723_v30 }
 0x47a   : > { %735 = vrot.lane.b32.xlu1 %v723_v30, %s1415_s27 }
 0x4e8   : > { %v731_v32 = vpop.permute.xlu1 %730  ;;  %v741_v34 = vpop.permute.xlu0 %740 }
 0x4e9   : > { %734 = vst.msk [vmem:[#allocation2 - $0x1] sm:$0x2] %vm733_vm6, %v731_v32 }
 0x4ea   : > { %748 = vst.msk [vmem:[#allocation2 - $0x4] sm:$0x20] %vm747_vm7, %v731_v32 }
 0x4ec   : > { %v736_v33 = vpop.permute.xlu1 %735 }
 0x4ed   : > { %739 = vst.msk [vmem:[#allocation2 - $0x2] sm:$0x4] %vm738_vm8, %v736_v33 }
 0x4ee   : > { %750 = vst.msk [vmem:[#allocation2 - $0x5] sm:$0x40] %vm749_vm9, %v736_v33 }
 0x4ef   : > { %744 = vst.msk [vmem:[#allocation2 - $0x3] sm:$0x8] %vm743_vm10, %v741_v34 }
 0x4f0   : > { %752 = vst.msk [vmem:[#allocation2 - $0x6] sm:$0x80] %vm751_vm11, %v741_v34 }
 0x4f7   : > { %v753_v35 = vld [vmem:[#allocation2] sm:$0x3] }
 0x4f8   : > { %1078 = vmatmul.mubr.msk.f32.vlgmr.msra.gmra.mrb[2].mxu1 %vm340_vm1, %v753_v35 }
 0x5cb   : > { %v839_v36 = vpop.f32.mrb[2].mxu1 }
 0x5cc   : > { %844 = vst.msk [vmem:[%s337_s13] sm:$0x3] %vm843_vm12, %v839_v36  ;;  %v1079_v37 = vpop.f32.mrb[3].mxu1 }
 0x5cd   : > { %1336 = shalt.err (!%p1333_p11)
}
 0x5ce   : > { %s1337_s23 = scalar_lea.hbm %s1721_s29, 32  ;;  %s1341_s14 = scalar_lea.hbm %s1769_s5, 128 }
 0x5cf   : > { %p1338_p8 = scmp.ne.s32.totalorder %s1721_s29, %s1337_s23  ;;  %p1342_p10 = scmp.lt.u32.totalorder %s1721_s29, %s1769_s5 }
 0x5d0   : > { %p1343_p2 = scmp.lt.u32.totalorder %s1341_s14, %s1337_s23  ;;  %p1345_p9 = scmp.lt.u32.totalorder %s1337_s23, %s1721_s29 }
 0x5d1   : > { %p1339_p7 = pnand %p1338_p8, %p1808_p0 }
 0x5d2   : > { %p1344_p1 = por %p1343_p2, %p1342_p10 }
 0x5d3   : > { %p1340_p5 = pneg %p1339_p7 }
 0x5d4   : > { %p1346_p12 = por %p1345_p9, %p1344_p1 }
 0x5d6   : > { %p1347_p4 = pnand %p1346_p12, %p1340_p5 }
 0x5d8   : > { %1350 = shalt.err (!%p1347_p4)
}
 0x5d9   : > { %1102 = dma.vmem_to_hbm [thread:$0]  (%p1808_p0), %s1723_s4, 32, %s1721_s29, %s846_s10  }
 0x5da PF: > { %p1130_p13 = scmp.ge.s32.totalorder %s1401_s21, 2  ;;  %s871_s8 = sand.u32 1, %s1389_s18  }
 0x5db   : > { %p1809_p6 = scmp.ne.s32.totalorder %s1785_s25, 0  ;;  %s872_s27 = scalar_lea.sflag [#allocation5], %s871_s8 }
 0x5dd   : > { %p1122_p3 = pnand %p1130_p13, %p1809_p6 }
 0x5df   : > { %1384 = dma.done.wait (!%p1122_p3), %s872_s27, 32  }
 0x5e0   : > { %1386 = vsyncadd (!%p1122_p3), %s872_s27, 4294967264  ;;  %s1810_s11 = sld [smem:[#allocation18_spill]]  ;;  %p22_p11 = scmp.ge.s32.totalorder %s1500_s30, 6  }
 0x5e1   : > { %s1811_s18 = smov %s1393_s19  ;;  %s1812_s19 = smov %s1397_s20 }
 0x5e2   : > { %s1814_s21 = smov %s1500_s30  ;;  %24 = sbr.rel (!%p22_p11) target bundleno = 11 (0xb), region = 118 }
 0x5e6   : > { %s1813_s20 = smov %s1810_s11 }
 0x5e9   :  { %877 = vsyncpa [#allocation4], 1 }
 0x5ea   :  { %879 = vsyncpa [#allocation4 + $0x1], 1 }
 0x5eb   :  { %880 = vsyncpa [#allocation7], 1 }
 0x5ec   :  { %882 = vsyncpa [#allocation7 + $0x1], 1 }
 0x5ed   :  { %883 = vsyncpa [#allocation10], 1 }
 0x5ee   :  { %885 = vsyncpa [#allocation10 + $0x1], 1 }
 0x5ef   :  { %886 = vsyncpa [#allocation5], 1 }
 0x5f0   :  { %888 = vsyncpa [#allocation5 + $0x1], 1 }

</bundles_post_ra>
